<compile_context>
chip_gen: v6e
topology: v6e:2x2x1
jax: 0.10.0
libtpu: 0.0.40
codegen_flags: <defaults>
</compile_context>

<pallas_src>
import jax
import jax.numpy as jnp
from jax.experimental import pallas as pl
from jax.experimental.pallas import tpu as pltpu


VMEM_LIMIT = 32 * 1024 * 1024   # explicit scoped-VMEM ceiling; safe on v5e/v6e/v7x


def lstm_stack_kernel(emb_ref, h_ref, c_ref, wcat_ref, b_ref,
                      h_out_ref, c_out_ref, xh_ref):
    """One LSTMCell layer per grid step (grid axis 0 = layer index).

    emb_ref  : (B, E)        f32   token embedding (resident across layers)
    h_ref    : (1, B, H)     f32   previous hidden state of this layer
    c_ref    : (1, B, H)     f32   previous cell state of this layer
    wcat_ref : (1, E+H, 4H)  bf16  fused [W_ih^T ; W_hh^T] of this layer
    b_ref    : (1, 1, 4H)    f32   pre-summed bias (b_ih + b_hh)
    h_out_ref: (1, B, H)     f32
    c_out_ref: (1, B, H)     f32
    xh_ref   : (B, E+H)      bf16  VMEM scratch: [layer input | h_prev]
    """
    layer = pl.program_id(0)
    H = h_ref.shape[-1]
    E = emb_ref.shape[-1]

    @pl.when(layer == 0)
    def _():
        xh_ref[:, :E] = emb_ref[...].astype(jnp.bfloat16)

    # Refresh the right half with this layer's previous hidden state.
    xh_ref[:, E:] = h_ref[0].astype(jnp.bfloat16)

    # Single fused gate matmul: (B, E+H) @ (E+H, 4H), bf16 MXU, f32 accumulate.
    gates = jnp.dot(xh_ref[...], wcat_ref[0],
                    preferred_element_type=jnp.float32) + b_ref[0]

    # PyTorch LSTMCell gate order: i, f, g, o (H lane-aligned -> clean slices).
    i_g = jax.nn.sigmoid(gates[:, 0 * H:1 * H])
    f_g = jax.nn.sigmoid(gates[:, 1 * H:2 * H])
    g_g = jnp.tanh(gates[:, 2 * H:3 * H])
    o_g = jax.nn.sigmoid(gates[:, 3 * H:4 * H])

    c_new = f_g * c_ref[0] + i_g * g_g
    h_new = o_g * jnp.tanh(c_new)

    h_out_ref[0] = h_new
    c_out_ref[0] = c_new
    xh_ref[:, :E] = h_new.astype(jnp.bfloat16)     # feeds the next layer


def vocab_proj_kernel(h_ref, wlo_ref, blo_ref, y_ref):
    """y tile = h_last @ W_lo_tile + b_lo_tile (grid tiles the vocab axis)."""
    y_ref[...] = (jnp.dot(h_ref[...], wlo_ref[...],
                          preferred_element_type=jnp.float32)
                  + blo_ref[...])


def rnnlm_forward(params, state, x, *, tile_v=2048):
    """Single-token RNNLM step: embedding glue + two fused Pallas kernels."""
    embed_W = params["embed"]      # (V, E)        f32
    wcat = params["wcat"]          # (L, E+H, 4H)  bf16
    b = params["b"]                # (L, 1, 4H)    f32
    wlo = params["wlo"]            # (H, V)        bf16
    blo = params["blo"]            # (1, V)        f32

    L = wcat.shape[0]
    H = wcat.shape[1] // 2         # stacked layout requires E == H
    E = embed_W.shape[1]
    B = x.shape[0]
    V = wlo.shape[1]

    if state is None:
        h0 = jnp.zeros((L, B, H), jnp.float32)
        c0 = jnp.zeros((L, B, H), jnp.float32)
    else:
        h0, c0 = state["h"], state["c"]

    # Embedding lookup (data-dependent gather) stays in plain JAX glue.
    emb = jnp.take(embed_W, x, axis=0)                          # (B, E)

    # ---- Kernel 1: stacked LSTMCell step, one layer per grid iteration. ----
    h_out, c_out = pl.pallas_call(
        lstm_stack_kernel,
        grid=(L,),
        in_specs=[
            pl.BlockSpec((B, E), lambda n: (0, 0)),                # emb (resident)
            pl.BlockSpec((1, B, H), lambda n: (n, 0, 0)),          # h_prev
            pl.BlockSpec((1, B, H), lambda n: (n, 0, 0)),          # c_prev
            pl.BlockSpec((1, E + H, 4 * H), lambda n: (n, 0, 0)),  # fused W (streamed)
            pl.BlockSpec((1, 1, 4 * H), lambda n: (n, 0, 0)),      # fused bias
        ],
        out_specs=(
            pl.BlockSpec((1, B, H), lambda n: (n, 0, 0)),
            pl.BlockSpec((1, B, H), lambda n: (n, 0, 0)),
        ),
        out_shape=(
            jax.ShapeDtypeStruct((L, B, H), jnp.float32),
            jax.ShapeDtypeStruct((L, B, H), jnp.float32),
        ),
        scratch_shapes=[pltpu.VMEM((B, E + H), jnp.bfloat16)],
        input_output_aliases={1: 0, 2: 1},     # h0 -> h_out, c0 -> c_out in place
        compiler_params=pltpu.CompilerParams(
            dimension_semantics=("arbitrary",),  # layers are sequential
            vmem_limit_bytes=VMEM_LIMIT),
    )(emb, h0, c0, wcat, b)

    # Cast once in the wrapper (avoids a redundant cast per vocab tile).
    h_last = h_out[L - 1].astype(jnp.bfloat16)                   # (B, H)

    # ---- Kernel 2: vocab projection, tiled & parallel over the vocab axis. --
    tv = min(tile_v, V)
    y = pl.pallas_call(
        vocab_proj_kernel,
        grid=(pl.cdiv(V, tv),),
        in_specs=[
            pl.BlockSpec((B, H), lambda j: (0, 0)),      # h_last (resident)
            pl.BlockSpec((H, tv), lambda j: (0, j)),     # W_lo tile (dbl-buffered)
            pl.BlockSpec((1, tv), lambda j: (0, j)),     # b_lo tile
        ],
        out_specs=pl.BlockSpec((B, tv), lambda j: (0, j)),
        out_shape=jax.ShapeDtypeStruct((B, V), jnp.float32),
        compiler_params=pltpu.CompilerParams(
            dimension_semantics=("parallel",),           # vocab tiles independent
            vmem_limit_bytes=VMEM_LIMIT),
    )(h_last, wlo, blo)

    return {"h": h_out, "c": c_out}, y


def init_params(key, n_vocab, n_layers, n_units, n_embed):
    """Uniform(-0.1, 0.1) init (as the PyTorch module), fused + bf16 weights."""
    assert n_embed == n_units, "stacked fused-weight layout requires n_embed == n_units"
    ks = jax.random.split(key, 3 + n_layers)
    u = lambda k, shape: jax.random.uniform(k, shape, jnp.float32, -0.1, 0.1)

    embed = u(ks[0], (n_vocab, n_embed))
    wcat, bias = [], []
    for n in range(n_layers):
        in_dim = n_embed if n == 0 else n_units
        k0, k1, k2, k3 = jax.random.split(ks[1 + n], 4)
        w_ih = u(k0, (4 * n_units, in_dim))          # PyTorch layout (4H, in)
        w_hh = u(k1, (4 * n_units, n_units))         # (4H, H)
        b_ih = u(k2, (4 * n_units,))
        b_hh = u(k3, (4 * n_units,))
        wcat.append(jnp.concatenate([w_ih.T, w_hh.T], axis=0))   # (in+H, 4H)
        bias.append((b_ih + b_hh).reshape(1, 4 * n_units))       # pre-summed
    w_lo = u(ks[-2], (n_vocab, n_units))             # (V, H)
    b_lo = u(ks[-1], (1, n_vocab))

    return {
        "embed": embed,                                   # (V, E)       f32
        "wcat": jnp.stack(wcat).astype(jnp.bfloat16),     # (L, E+H, 4H) bf16
        "b": jnp.stack(bias),                             # (L, 1, 4H)   f32
        "wlo": w_lo.T.astype(jnp.bfloat16),               # (H, V)       bf16
        "blo": b_lo,                                      # (1, V)       f32
    }


def reference_forward(params, x):
    """Pure-JAX f32 reference (same bf16-quantized weights) for validation."""
    wcat = params["wcat"].astype(jnp.float32)
    wlo = params["wlo"].astype(jnp.float32)
    L = wcat.shape[0]
    H = wcat.shape[1] // 2
    B = x.shape[0]
    emb = jnp.take(params["embed"], x, axis=0)
    inp = emb
    hs, cs = [], []
    for n in range(L):
        h_prev = jnp.zeros((B, H), jnp.float32)
        c_prev = jnp.zeros((B, H), jnp.float32)
        xh = jnp.concatenate([inp, h_prev], axis=-1)
        gates = xh @ wcat[n] + params["b"][n]
        i_g = jax.nn.sigmoid(gates[:, 0 * H:1 * H])
        f_g = jax.nn.sigmoid(gates[:, 1 * H:2 * H])
        g_g = jnp.tanh(gates[:, 2 * H:3 * H])
        o_g = jax.nn.sigmoid(gates[:, 3 * H:4 * H])
        c_new = f_g * c_prev + i_g * g_g
        h_new = o_g * jnp.tanh(c_new)
        hs.append(h_new)
        cs.append(c_new)
        inp = h_new
    y = inp @ wlo + params["blo"]
    return jnp.stack(hs), jnp.stack(cs), y


if __name__ == "__main__":
    # Small but hardware-friendly shapes: H multiple of 128, B multiple of 8,
    # V a multiple of the vocab tile (tile exercises the projection grid).
    n_vocab, n_layers, n_units = 1024, 2, 128
    n_embed = n_units
    batch = 8
    tile_v = 256

    key = jax.random.PRNGKey(0)
    pkey, xkey = jax.random.split(key)
    params = init_params(pkey, n_vocab, n_layers, n_units, n_embed)
    x = jax.random.randint(xkey, (batch,), 0, n_vocab, dtype=jnp.int32)

    state, y = rnnlm_forward(params, None, x, tile_v=tile_v)
    jax.block_until_ready((state, y))

    # Validate against the pure-JAX reference (bf16 weights => looser tolerance).
    h_ref, c_ref, y_ref = reference_forward(params, x)
    assert y.shape == (batch, n_vocab)
    assert jnp.allclose(state["h"], h_ref, atol=1e-2, rtol=1e-2)
    assert jnp.allclose(state["c"], c_ref, atol=1e-2, rtol=1e-2)
    assert jnp.allclose(y, y_ref, atol=1e-2, rtol=1e-2)

    print("KERNEL_OK")
</pallas_src>

<mosaic_0001>
module attributes {stable_mosaic.version = 11 : i64} {
  func.func @lstm_stack_kernel(%arg0: i32, %arg1: memref<8x128xf32, #tpu.memory_space<vmem>>, %arg2: memref<1x8x128xf32, #tpu.memory_space<vmem>>, %arg3: memref<1x8x128xf32, #tpu.memory_space<vmem>>, %arg4: memref<1x256x512xbf16, #tpu.memory_space<vmem>>, %arg5: memref<1x1x512xf32, #tpu.memory_space<vmem>>, %arg6: memref<1x8x128xf32, #tpu.memory_space<vmem>>, %arg7: memref<1x8x128xf32, #tpu.memory_space<vmem>>, %arg8: memref<8x256xbf16, #tpu.memory_space<vmem>>) attributes {dimension_semantics = [#tpu.dimension_semantics<arbitrary>], iteration_bounds = array<i64: 2>, scalar_prefetch = 0 : i64, scratch_operands = 1 : i64, tpu.core_type = #tpu.core_type<tc>, window_params = [{pipeline_mode = #tpu.pipeline_mode<synchronous>, transform_indices = @transform_0, window_bounds = array<i64: 8, 128>}, {transform_indices = @transform_1, window_bounds = array<i64: 1, 8, 128>}, {transform_indices = @transform_2, window_bounds = array<i64: 1, 8, 128>}, {transform_indices = @transform_3, window_bounds = array<i64: 1, 256, 512>}, {transform_indices = @transform_4, window_bounds = array<i64: 1, 1, 512>}, {transform_indices = @transform_5, window_bounds = array<i64: 1, 8, 128>}, {transform_indices = @transform_6, window_bounds = array<i64: 1, 8, 128>}]} {
    %c0_i32 = arith.constant 0 : i32
    %0 = arith.cmpi eq, %arg0, %c0_i32 : i32
    %1 = arith.extui %0 : i1 to i32
    %c0_i32_0 = arith.constant 0 : i32
    %2 = arith.cmpi ne, %1, %c0_i32_0 : i32
    scf.if %2 {
      %c0_26 = arith.constant 0 : index
      %c0_27 = arith.constant 0 : index
      %50 = vector.load %arg1[%c0_26, %c0_27] : memref<8x128xf32, #tpu.memory_space<vmem>>, vector<8x128xf32>
      %51 = arith.truncf %50 : vector<8x128xf32> to vector<8x128xbf16>
      %c0_28 = arith.constant 0 : index
      %c0_29 = arith.constant 0 : index
      %52 = vector.load %arg8[%c0_28, %c0_29] : memref<8x256xbf16, #tpu.memory_space<vmem>>, vector<8x128xbf16>
      tpu.vector_store %arg8[%c0_28, %c0_29], %51 {strides = array<i32>} : memref<8x256xbf16, #tpu.memory_space<vmem>>, vector<8x128xbf16>,
    } else {
    }
    %c0 = arith.constant 0 : index
    %c0_1 = arith.constant 0 : index
    %c0_2 = arith.constant 0 : index
    %3 = vector.load %arg2[%c0, %c0_1, %c0_2] : memref<1x8x128xf32, #tpu.memory_space<vmem>>, vector<1x8x128xf32>
    %4 = vector.shape_cast %3 : vector<1x8x128xf32> to vector<8x128xf32>
    %5 = arith.truncf %4 : vector<8x128xf32> to vector<8x128xbf16>
    %c0_3 = arith.constant 0 : index
    %c128 = arith.constant 128 : index
    %6 = vector.load %arg8[%c0_3, %c128] : memref<8x256xbf16, #tpu.memory_space<vmem>>, vector<8x128xbf16>
    tpu.vector_store %arg8[%c0_3, %c128], %5 {strides = array<i32>} : memref<8x256xbf16, #tpu.memory_space<vmem>>, vector<8x128xbf16>,
    %c0_4 = arith.constant 0 : index
    %c0_5 = arith.constant 0 : index
    %7 = vector.load %arg8[%c0_4, %c0_5] : memref<8x256xbf16, #tpu.memory_space<vmem>>, vector<8x256xbf16>
    %c0_6 = arith.constant 0 : index
    %c0_7 = arith.constant 0 : index
    %c0_8 = arith.constant 0 : index
    %8 = vector.load %arg4[%c0_6, %c0_7, %c0_8] : memref<1x256x512xbf16, #tpu.memory_space<vmem>>, vector<1x256x512xbf16>
    %9 = vector.shape_cast %8 : vector<1x256x512xbf16> to vector<256x512xbf16>
    %cst = arith.constant dense<0.000000e+00> : vector<8x512xf32>
    %10 = tpu.matmul %7, %9, %cst {dimension_numbers = #tpu.dot_dimension_numbers<[1], [0], [0], [1], [0, 0, 1, 1], [], []>} : vector<8x256xbf16>, vector<256x512xbf16>, vector<8x512xf32> -> vector<8x512xf32>
    %c0_9 = arith.constant 0 : index
    %c0_10 = arith.constant 0 : index
    %c0_11 = arith.constant 0 : index
    %11 = vector.load %arg5[%c0_9, %c0_10, %c0_11] : memref<1x1x512xf32, #tpu.memory_space<vmem>>, vector<1x1x512xf32>
    %12 = vector.shape_cast %11 : vector<1x1x512xf32> to vector<1x512xf32>
    %13 = vector.broadcast %12 : vector<1x512xf32> to vector<8x512xf32>
    %14 = arith.addf %10, %13 : vector<8x512xf32>
    %15 = vector.extract_strided_slice %14 {offsets = [0, 0], sizes = [8, 128], strides = [1, 1]} : vector<8x512xf32> to vector<8x128xf32>
    %16 = arith.negf %15 : vector<8x128xf32>
    %17 = math.exp %16 : vector<8x128xf32>
    %cst_12 = arith.constant 1.000000e+00 : f32
    %18 = vector.broadcast %cst_12 : f32 to vector<8x128xf32>
    %19 = arith.addf %18, %17 : vector<8x128xf32>
    %20 = arith.divf %18, %19 : vector<8x128xf32>
    %21 = vector.extract_strided_slice %14 {offsets = [0, 128], sizes = [8, 128], strides = [1, 1]} : vector<8x512xf32> to vector<8x128xf32>
    %22 = arith.negf %21 : vector<8x128xf32>
    %23 = math.exp %22 : vector<8x128xf32>
    %cst_13 = arith.constant 1.000000e+00 : f32
    %24 = vector.broadcast %cst_13 : f32 to vector<8x128xf32>
    %25 = arith.addf %24, %23 : vector<8x128xf32>
    %26 = arith.divf %24, %25 : vector<8x128xf32>
    %27 = vector.extract_strided_slice %14 {offsets = [0, 256], sizes = [8, 128], strides = [1, 1]} : vector<8x512xf32> to vector<8x128xf32>
    %28 = math.tanh %27 : vector<8x128xf32>
    %29 = vector.extract_strided_slice %14 {offsets = [0, 384], sizes = [8, 128], strides = [1, 1]} : vector<8x512xf32> to vector<8x128xf32>
    %30 = arith.negf %29 : vector<8x128xf32>
    %31 = math.exp %30 : vector<8x128xf32>
    %cst_14 = arith.constant 1.000000e+00 : f32
    %32 = vector.broadcast %cst_14 : f32 to vector<8x128xf32>
    %33 = arith.addf %32, %31 : vector<8x128xf32>
    %34 = arith.divf %32, %33 : vector<8x128xf32>
    %c0_15 = arith.constant 0 : index
    %c0_16 = arith.constant 0 : index
    %c0_17 = arith.constant 0 : index
    %35 = vector.load %arg3[%c0_15, %c0_16, %c0_17] : memref<1x8x128xf32, #tpu.memory_space<vmem>>, vector<1x8x128xf32>
    %36 = vector.shape_cast %35 : vector<1x8x128xf32> to vector<8x128xf32>
    %37 = arith.mulf %26, %36 : vector<8x128xf32>
    %38 = arith.mulf %20, %28 : vector<8x128xf32>
    %39 = arith.addf %37, %38 : vector<8x128xf32>
    %40 = math.tanh %39 : vector<8x128xf32>
    %41 = arith.mulf %34, %40 : vector<8x128xf32>
    %c0_18 = arith.constant 0 : index
    %c0_19 = arith.constant 0 : index
    %c0_20 = arith.constant 0 : index
    %42 = vector.load %arg6[%c0_18, %c0_19, %c0_20] : memref<1x8x128xf32, #tpu.memory_space<vmem>>, vector<1x8x128xf32>
    %43 = vector.shape_cast %42 : vector<1x8x128xf32> to vector<8x128xf32>
    %44 = vector.shape_cast %41 : vector<8x128xf32> to vector<1x8x128xf32>
    tpu.vector_store %arg6[%c0_18, %c0_19, %c0_20], %44 {strides = array<i32>} : memref<1x8x128xf32, #tpu.memory_space<vmem>>, vector<1x8x128xf32>,
    %c0_21 = arith.constant 0 : index
    %c0_22 = arith.constant 0 : index
    %c0_23 = arith.constant 0 : index
    %45 = vector.load %arg7[%c0_21, %c0_22, %c0_23] : memref<1x8x128xf32, #tpu.memory_space<vmem>>, vector<1x8x128xf32>
    %46 = vector.shape_cast %45 : vector<1x8x128xf32> to vector<8x128xf32>
    %47 = vector.shape_cast %39 : vector<8x128xf32> to vector<1x8x128xf32>
    tpu.vector_store %arg7[%c0_21, %c0_22, %c0_23], %47 {strides = array<i32>} : memref<1x8x128xf32, #tpu.memory_space<vmem>>, vector<1x8x128xf32>,
    %48 = arith.truncf %41 : vector<8x128xf32> to vector<8x128xbf16>
    %c0_24 = arith.constant 0 : index
    %c0_25 = arith.constant 0 : index
    %49 = vector.load %arg8[%c0_24, %c0_25] : memref<8x256xbf16, #tpu.memory_space<vmem>>, vector<8x128xbf16>
    tpu.vector_store %arg8[%c0_24, %c0_25], %48 {strides = array<i32>} : memref<8x256xbf16, #tpu.memory_space<vmem>>, vector<8x128xbf16>,
    return
  }
  func.func @transform_0(%arg0: i32) -> (i32, i32) {
    %c0_i32 = arith.constant 0 : i32
    %c0_i32_0 = arith.constant 0 : i32
    %c0_i32_1 = arith.constant 0 : i32
    return %c0_i32, %c0_i32_0 : i32, i32
  }
  func.func @transform_1(%arg0: i32) -> (i32, i32, i32) {
    %c0_i32 = arith.constant 0 : i32
    %c0_i32_0 = arith.constant 0 : i32
    %c0_i32_1 = arith.constant 0 : i32
    return %arg0, %c0_i32, %c0_i32_0 : i32, i32, i32
  }
  func.func @transform_2(%arg0: i32) -> (i32, i32, i32) {
    %c0_i32 = arith.constant 0 : i32
    %c0_i32_0 = arith.constant 0 : i32
    %c0_i32_1 = arith.constant 0 : i32
    return %arg0, %c0_i32, %c0_i32_0 : i32, i32, i32
  }
  func.func @transform_3(%arg0: i32) -> (i32, i32, i32) {
    %c0_i32 = arith.constant 0 : i32
    %c0_i32_0 = arith.constant 0 : i32
    %c0_i32_1 = arith.constant 0 : i32
    return %arg0, %c0_i32, %c0_i32_0 : i32, i32, i32
  }
  func.func @transform_4(%arg0: i32) -> (i32, i32, i32) {
    %c0_i32 = arith.constant 0 : i32
    %c0_i32_0 = arith.constant 0 : i32
    %c0_i32_1 = arith.constant 0 : i32
    return %arg0, %c0_i32, %c0_i32_0 : i32, i32, i32
  }
  func.func @transform_5(%arg0: i32) -> (i32, i32, i32) {
    %c0_i32 = arith.constant 0 : i32
    %c0_i32_0 = arith.constant 0 : i32
    %c0_i32_1 = arith.constant 0 : i32
    return %arg0, %c0_i32, %c0_i32_0 : i32, i32, i32
  }
  func.func @transform_6(%arg0: i32) -> (i32, i32, i32) {
    %c0_i32 = arith.constant 0 : i32
    %c0_i32_0 = arith.constant 0 : i32
    %c0_i32_1 = arith.constant 0 : i32
    return %arg0, %c0_i32, %c0_i32_0 : i32, i32, i32
  }
}

</mosaic_0001>

<bundles_post_ra>
// kernel: tpu_custom_call.1
= control target key start
LH: loop header
LB: loop body
LE: loop exit
PB: predicated region body
PF: predicated region fallthrough
CT: control target
= control target key end

     0   :  { %s1936_s0 = inlined_call_operand.vmem [shape: f32[8,128], index: 0, kind: input, shape index: {}]   ;;  %s1937_s1 = inlined_call_operand.hbm [shape: f32[2,8,128], index: 1, kind: input, shape index: {}, may-alias: {1,5}]   ;;  %s1938_s2 = inlined_call_operand.hbm [shape: f32[2,8,128], index: 2, kind: input, shape index: {}, may-alias: {2,6}]   ;;  %s1939_s3 = inlined_call_operand.hbm [shape: bf16[2,256,512], index: 3, kind: input, shape index: {}]   ;;  %s1940_s4 = inlined_call_operand.vmem [shape: f32[2,1,512], index: 4, kind: input, shape index: {}]   ;;  %s1941_s5 = inlined_call_operand.hbm [shape: f32[2,8,128], index: 5, kind: output, shape index: {0}, may-alias: {1,5}]   ;;  %s1942_s6 = inlined_call_operand.hbm [shape: f32[2,8,128], index: 6, kind: output, shape index: {1}, may-alias: {2,6}]  }
   0x1   :  { %1951 = sst [smem:[#allocation20_spill]] %s1938_s2 }
   0x2   :  { %12 = vsyncpa [#allocation4], 0 }
   0x3   :  { %14 = vsyncpa [#allocation4 + $0x1], 0 }
   0x4   :  { %15 = vsyncpa [#allocation7], 0 }
   0x5   :  { %17 = vsyncpa [#allocation7 + $0x1], 0 }
   0x6   :  { %18 = vsyncpa [#allocation5], 0 }
   0x7   :  { %20 = vsyncpa [#allocation5 + $0x1], 0 }
   0x8   :  { %21 = vsyncpa [#allocation11], 0 }
   0x9   :  { %23 = vsyncpa [#allocation11 + $0x1], 0  ;;  %s1590_s21 = smov 0   ;;  %s1592_s22 = smov 0  }
   0xa   :  { %s1594_s23 = smov 0   ;;  %s1596_s24 = smov 0  }
   0xb LB: > { %1952 = sst [smem:[#allocation16_spill]] %s1542_s23  ;;  %s1611_s25 = sadd.s32 4294967295, %s1546_s24   ;;  %s1546_s24 = sphi %s1596_s24, %s1971_s24   ;;  %s1542_s23 = sphi %s1594_s23, %s1973_s23   ;;  %s1538_s22 = sphi %s1592_s22, %s1975_s22   ;;  %s1534_s21 = sphi %s1590_s21, %s1974_s21  }
   0xc   : > { %1953 = sst [smem:[#allocation17_spill]] %s1546_s24  ;;  %s1093_s26 = sadd.s32 4294967294, %s1546_s24  }
   0xd   : > { %s1615_s27 = sadd.s32 1, %s1546_s24   ;;  %s57_s28 = sadd.s32 1, %s1542_s23 }
   0xe   : > { %1954 = sst [smem:[#allocation18_spill]] %s1615_s27  ;;  %s54_s29 = ssub.s32 %s1546_s24, %s1615_s27 }
   0xf   : > { %p64_p0 = scmp.ne.s32.totalorder %s1542_s23, %s1538_s22  ;;  %p55_p1 = scmp.eq.s32.totalorder %s54_s29, 0 }
  0x10   : > { %p65_p2 = scmp.eq.s32.totalorder %s1546_s24, 0  ;;  %p70_p3 = scmp.ne.s32.totalorder %s1538_s22, %s1534_s21 }
  0x11   : > { %p71_p4 = scmp.eq.s32.totalorder %s1611_s25, 0  ;;  %p172_p7 = scmp.eq.s32.totalorder %s1611_s25, 1 }
  0x12   : > { %s1627_s30 = scalar_select %p55_p1, %s1542_s23, %s57_s28  }
  0x13   : > { %p66_p5 = por %p65_p2, %p64_p0  ;;  %p1629_p6 = por %p71_p4, %p70_p3 }
  0x14   : > { %1955 = sst [smem:[#allocation19_spill]] %s1627_s30  ;;  %p178_p8 = scmp.eq.s32.totalorder %s1093_s26, 1 }
  0x15   : > { %s1956_s7 = scalar_select %p1629_p6, 1, 0 }
  0x16   : > { %p1214_p10 = scmp.lt.s32.totalorder %s1546_s24, 2  ;;  %p1636_p11 = por %p172_p7, %p64_p0 }
  0x17   : > { %p1640_p12 = por %p178_p8, %p70_p3  ;;  %s1645_s10 = sand.u32 1, %s1542_s23  }
  0x18   : > { %s1957_s8 = scalar_select %p1636_p11, 1, 0 }
  0x19   : > { %s1958_s9 = scalar_select %p1640_p12, 1, 0 }
  0x1a   : > { %s1944_s11 = sshll.u32 %s1546_s24, 7  ;;  %s1943_s12 = sshll.u32 %s1645_s10, 3 }
  0x1b   : > { %p1649_p13 = pnand %p1214_p10, %p66_p5  ;;  %s245_s14 = sand.u32 1, %s1546_s24  }
  0x1c   : > { %s1960_s2 = sld [smem:[#allocation20_spill]]  ;;  %s249_s18 = scalar_lea.vmem [#allocation6], %s1943_s12 }
  0x1d   : > { %s256_s19 = sshll.u32 %s249_s18, 4  ;;  %s1100_s20 = sshll.u32 %s1645_s10, 9  ;;  %s257_s19 = int_to_ptr.vmem [resolvable:$true] %s256_s19 }
  0x1e   : > { %s1664_s26 = scalar_lea.sflag [#allocation7], %s245_s14  ;;  %p1670_p1 = pneg %p1649_p13 }
  0x22   : > { %s1659_s17 = scalar_lea.hbm %s1960_s2, %s1944_s11  ;;  %s1369_s12 = scalar_lea.hbm %s1960_s2, 256 }
  0x23   : > { %s1364_s28 = scalar_lea.hbm %s1659_s17, 128  ;;  %p1370_p4 = scmp.lt.s32.totalorder %s1659_s17, %s1960_s2 }
  0x24   : > { %p1365_p0 = scmp.ne.s32.totalorder %s1659_s17, %s1364_s28  ;;  %p1371_p5 = scmp.lt.s32.totalorder %s1369_s12, %s1364_s28 }
  0x26   : > { %p1367_p2 = pnand %p1670_p1, %p1365_p0  ;;  %p1372_p7 = por %p1371_p5, %p1370_p4 }
  0x28   : > { %p1368_p3 = pneg %p1367_p2 }
  0x2a   : > { %p1373_p8 = pnand %p1372_p7, %p1368_p3 }
  0x2c   : > { %1376 = shalt.err (!%p1373_p8)
}
  0x2d   : > { %s1377_s14 = scalar_lea.vmem %s257_s19, 128  ;;  %s1548_s30 = smov [#allocation6]  }
  0x2e   : > { %p1378_p10 = scmp.ne.s32.totalorder %s257_s19, %s1377_s14  ;;  %s1382_s23 = sshll.u32 %s1548_s30, 4  ;;  %s1383_s23 = int_to_ptr.vmem [resolvable:$false] %s1382_s23 }
  0x2f   : > { %s1384_s27 = scalar_lea.vmem %s1383_s23, 256  ;;  %p1385_p0 = scmp.lt.s32.totalorder %s257_s19, %s1383_s23 }
  0x30   : > { %p1380_p9 = pnand %p1378_p10, %p1670_p1  ;;  %p1386_p2 = scmp.lt.s32.totalorder %s1384_s27, %s1377_s14 }
  0x32   : > { %p1381_p12 = pneg %p1380_p9  ;;  %p1387_p11 = por %p1386_p2, %p1385_p0 }
  0x34   : > { %p1388_p6 = pnand %p1387_p11, %p1381_p12 }
  0x36   : > { %1391 = shalt.err (!%p1388_p6)
}
  0x37   : > { %1203 = dma.hbm_to_vmem [thread:$0]  (!%p1649_p13), %s1659_s17, 128, %s257_s19, %s1664_s26  }
  0x38   : > { %p1103_p9 = scmp.ge.s32.totalorder %s1546_s24, 1  ;;  %s267_s30 = scalar_lea.vmem [#allocation8], %s1100_s20 }
  0x39   : > { %s274_s11 = sshll.u32 %s267_s30, 4  ;;  %p289_p3 = scmp.lt.s32.totalorder %s1546_s24, 3  ;;  %s1691_s11 = int_to_ptr.vmem [resolvable:$true] %s274_s11 }
  0x3a   : > { %s1963_s27 = sshll.u32 %s1546_s24, 7  ;;  %s1964_s16 = sshll.u32 %s1645_s10, 3 }
  0x3b   : > { %p1693_p11 = pnand %p1103_p9, %p289_p3  ;;  %s1702_s15 = scalar_lea.hbm %s1937_s1, %s1963_s27 }
  0x3c   : > { %s231_s17 = scalar_lea.vmem [#allocation3], %s1964_s16  ;;  %s1186_s20 = sshll.u32 %s1546_s24, 13 }
  0x3d   : > { %s1962_s23 = scalar_select %p1693_p11, 1, 0 }
  0x3e   : > { %s238_s19 = sshll.u32 %s231_s17, 4  ;;  %s228_s18 = scalar_lea.sflag [#allocation4], %s1645_s10  ;;  %s239_s19 = int_to_ptr.vmem [resolvable:$true] %s238_s19 }
  0x3f   : > { %s1392_s14 = scalar_lea.hbm %s1702_s15, 128  ;;  %s1397_s12 = scalar_lea.hbm %s1937_s1, 256 }
  0x40   : > { %p1393_p6 = scmp.ne.s32.totalorder %s1702_s15, %s1392_s14  ;;  %p1398_p5 = scmp.lt.s32.totalorder %s1702_s15, %s1937_s1 }
  0x41   : > { %p1399_p7 = scmp.lt.s32.totalorder %s1397_s12, %s1392_s14 }
  0x42   : > { %p1395_p12 = pnand %p1393_p6, %p1670_p1 }
  0x43   : > { %p1400_p8 = por %p1399_p7, %p1398_p5 }
  0x44   : > { %p1396_p4 = pneg %p1395_p12 }
  0x46   : > { %p1401_p10 = pnand %p1400_p8, %p1396_p4 }
  0x48   : > { %1404 = shalt.err (!%p1401_p10)
}
  0x49   : > { %s1405_s16 = scalar_lea.vmem %s239_s19, 128  ;;  %s1549_s10 = smov [#allocation3]  }
  0x4a   : > { %p1406_p0 = scmp.ne.s32.totalorder %s239_s19, %s1405_s16  ;;  %s1410_s17 = sshll.u32 %s1549_s10, 4  ;;  %s1411_s17 = int_to_ptr.vmem [resolvable:$false] %s1410_s17 }
  0x4b   : > { %s1412_s24 = scalar_lea.vmem %s1411_s17, 256  ;;  %p1413_p3 = scmp.lt.s32.totalorder %s239_s19, %s1411_s17 }
  0x4c   : > { %p1408_p2 = pnand %p1406_p0, %p1670_p1  ;;  %p1414_p6 = scmp.lt.s32.totalorder %s1412_s24, %s1405_s16 }
  0x4e   : > { %p1409_p9 = pneg %p1408_p2  ;;  %p1415_p12 = por %p1414_p6, %p1413_p3 }
  0x50   : > { %p1416_p11 = pnand %p1415_p12, %p1409_p9 }
  0x52   : > { %1419 = shalt.err (!%p1416_p11)
}
  0x53   : > { %1200 = dma.hbm_to_vmem [thread:$0]  (!%p1649_p13), %s1702_s15, 128, %s239_s19, %s228_s18  }
  0x54   : > { %s1727_s30 = scalar_lea.hbm %s1939_s3, %s1186_s20  ;;  %s1425_s28 = scalar_lea.hbm %s1939_s3, 16384 }
  0x55   : > { %s1420_s12 = scalar_lea.hbm %s1727_s30, 8192  ;;  %p1426_p11 = scmp.lt.s32.totalorder %s1727_s30, %s1939_s3 }
  0x56   : > { %p1421_p4 = scmp.ne.s32.totalorder %s1727_s30, %s1420_s12  ;;  %p1427_p8 = scmp.lt.s32.totalorder %s1425_s28, %s1420_s12 }
  0x58   : > { %p1423_p5 = pnand %p1421_p4, %p1670_p1  ;;  %p1428_p10 = por %p1427_p8, %p1426_p11 }
  0x5a   : > { %p1424_p7 = pneg %p1423_p5 }
  0x5c   : > { %p1429_p0 = pnand %p1428_p10, %p1424_p7 }
  0x5e   : > { %1432 = shalt.err (!%p1429_p0)
}
  0x5f   : > { %s1433_s15 = scalar_lea.vmem %s1691_s11, 8192  ;;  %s1550_s19 = smov [#allocation8]  }
  0x60   : > { %p1434_p2 = scmp.ne.s32.totalorder %s1691_s11, %s1433_s15  ;;  %s1438_s20 = sshll.u32 %s1550_s19, 4  ;;  %s1439_s20 = int_to_ptr.vmem [resolvable:$false] %s1438_s20 }
  0x61   : > { %s1440_s18 = scalar_lea.vmem %s1439_s20, 16384  ;;  %p1441_p6 = scmp.lt.s32.totalorder %s1691_s11, %s1439_s20 }
  0x62   : > { %p1436_p9 = pnand %p1434_p2, %p1670_p1  ;;  %p1442_p12 = scmp.lt.s32.totalorder %s1440_s18, %s1433_s15 }
  0x64   : > { %p1437_p3 = pneg %p1436_p9  ;;  %p1443_p4 = por %p1442_p12, %p1441_p6 }
  0x66   : > { %p1444_p5 = pnand %p1443_p4, %p1437_p3 }
  0x68   : > { %1447 = shalt.err (!%p1444_p5)
}
  0x69   : > { %s1551_s17 = smov 256   ;;  %s1552_s2 = smov 16  }
  0x6a   : > { %1206 = dma.hbm_to_vmem [thread:$0]  (!%p1649_p13), %s1727_s30, 8192, %s1691_s11, %s1664_s26, %s1551_s17, %s1551_s17, %s1552_s2  }
  0x6b   : > { %p1965_p1 = scmp.ne.s32.totalorder %s1962_s23, 0 }
  0x6c   : > { %s1753_s29 = sand.u32 (!%p1965_p1), 1, %s1538_s22   ;;  %p1966_p7 = scmp.ne.s32.totalorder (!%p1965_p1), %s1956_s7, 0 }
  0x6d   : > { %293 = sbr.rel (%p1965_p1) target bundleno = 466 (0x1d2), region = 40  ;;  %s1756_s14 = sshll.u32 (!%p1965_p1), %s1753_s29, 3 }
  0x6e   : > { %s296_s12 = scalar_lea.sflag (!%p1965_p1), [#allocation4], %s1753_s29  ;;  %s299_s24 = scalar_lea.vmem (!%p1965_p1), [#allocation3], %s1756_s14 }
  0x72   : > { %1517 = dma.done.wait (%p1966_p7), %s296_s12, 128  }
  0x73   : > { %1519 = vsyncadd (%p1966_p7), %s296_s12, 4294967168  ;;  %s304_s13 = sand.u32 1, %s1611_s25   ;;  %s308_s11 = scalar_lea.vmem [#allocation6], %s1756_s14 }
  0x74   : > { %s305_s26 = scalar_lea.sflag [#allocation7], %s304_s13 }
  0x75   : > { %1521 = dma.done.wait (%p1966_p7), %s305_s26, 8320  }
  0x76   : > { %1523 = vsyncadd (%p1966_p7), %s305_s26, 4294958976  ;;  %s1106_s23 = sshll.u32 %s1753_s29, 9  ;;  %p365_p13 = scmp.lt.s32.totalorder %s1611_s25, 1 }
  0x77   : > { %s1778_s15 = scalar_lea.vmem [#allocation8], %s1106_s23  ;;  %s357_s19 = scalar_lea.vmem [#allocation9], %s1756_s14 }
  0x78   : > { %s366_s30 = scalar_select %p365_p13, %s1611_s25, 1 }
  0x79   : > { %s364_s20 = scalar_lea.vmem [#allocation10], %s1756_s14  ;;  %p1110_p11 = scmp.ne.s32.totalorder %s1611_s25, 0 }
  0x7a   : > { %s1109_s27 = sshll.u32 %s366_s30, 2 }
  0x7b   : > { %s1776_s10 = scalar_lea.vmem %s1940_s4, %s1109_s27  ;;  %372 = sbr.rel (%p1110_p11) target bundleno = 132 (0x84), region = 56 }
  0x80   : > { %v373_v0 = vld [vmem:[%s1936_s0] sm:$0xff] }
  0x81   : > { %v374_v1 = vpack.c.bf16 %v373_v0, %v373_v0 }
  0x83   : > { %375 = vst [vmem:[#allocation2] sm:$0xf] %v374_v1 }
  0x84 PF: > { %v1250_v2 = vld [vmem:[%s1778_s15 + $0xe4] ss:$16 sps:$4 sm:$0xff]   ;;  %v1252_v3 = vld [vmem:[%s1778_s15 + $0xe0] ss:$16 sps:$4 sm:$0xff]   ;;  %v1261_v7 = vld [vmem:[%s1778_s15 + $0xec] ss:$16 sps:$4 sm:$0xff]  }
  0x85   : > { %793 = vmatprep.subr.bf16.mxu0 %v1250_v2  ;;  %v1253_v4 = vld [vmem:[%s1778_s15 + $0xc4] ss:$16 sps:$4 sm:$0xff]   ;;  %v1255_v5 = vld [vmem:[%s1778_s15 + $0xc0] ss:$16 sps:$4 sm:$0xff]   ;;  %v1264_v8 = vld [vmem:[%s1778_s15 + $0xe8] ss:$16 sps:$4 sm:$0xff]   ;;  %834 = vmatprep.subr.bf16.mxu1 %v1261_v7  ;;  %v446_v7 = vlaneseq }
  0x86   : > { %794 = vmatpush1.bf16.msra.mxu0 %v1252_v3  ;;  %v1256_v6 = vld [vmem:[%s1778_s15 + $0xa4] ss:$16 sps:$4 sm:$0xff]   ;;  %v1258_v9 = vld [vmem:[%s1778_s15 + $0xa0] ss:$16 sps:$4 sm:$0xff]   ;;  %835 = vmatpush1.bf16.msra.mxu1 %v1264_v8  ;;  %v1267_v11 = vld [vmem:[%s1778_s15 + $0xcc] ss:$16 sps:$4 sm:$0xff]  }
  0x87   : > { %795 = vmatprep.subr.bf16.mxu0 %v1253_v4  ;;  %v1259_v10 = vld [vmem:[%s1778_s15 + $0x84] ss:$16 sps:$4 sm:$0xff]   ;;  %v1270_v12 = vld [vmem:[%s1778_s15 + $0xc8] ss:$16 sps:$4 sm:$0xff]   ;;  %836 = vmatprep.subr.bf16.mxu1 %v1267_v11  ;;  %v1263_v13 = vld [vmem:[%s1778_s15 + $0x80] ss:$16 sps:$4 sm:$0xff]  }
  0x88   : > { %v1265_v14 = vld [vmem:[%s1778_s15 + $0x64] ss:$16 sps:$4 sm:$0xff]   ;;  %v1273_v15 = vld [vmem:[%s1778_s15 + $0xac] ss:$16 sps:$4 sm:$0xff]   ;;  %v1276_v16 = vld [vmem:[%s1778_s15 + $0xa8] ss:$16 sps:$4 sm:$0xff]  }
  0x89   : > { %v1279_v17 = vld [vmem:[%s1778_s15 + $0x8c] ss:$16 sps:$4 sm:$0xff]   ;;  %v1269_v18 = vld [vmem:[%s1778_s15 + $0x60] ss:$16 sps:$4 sm:$0xff]   ;;  %v1271_v19 = vld [vmem:[%s1778_s15 + $0x44] ss:$16 sps:$4 sm:$0xff]  }
  0x8a   : > { %796 = vmatpush1.bf16.msra.mxu0 %v1255_v5  ;;  %837 = vmatpush1.bf16.msra.mxu1 %v1270_v12  ;;  %v1282_v20 = vld [vmem:[%s1778_s15 + $0x88] ss:$16 sps:$4 sm:$0xff]   ;;  %v1285_v21 = vld [vmem:[%s1778_s15 + $0x6c] ss:$16 sps:$4 sm:$0xff]   ;;  %v1275_v22 = vld [vmem:[%s1778_s15 + $0x40] ss:$16 sps:$4 sm:$0xff]  }
  0x8b   : > { %797 = vmatprep.subr.bf16.mxu0 %v1256_v6  ;;  %838 = vmatprep.subr.bf16.mxu1 %v1273_v15  ;;  %v1277_v23 = vld [vmem:[%s1778_s15 + $0x24] ss:$16 sps:$4 sm:$0xff]   ;;  %v1288_v24 = vld [vmem:[%s1778_s15 + $0x68] ss:$16 sps:$4 sm:$0xff]   ;;  %v1291_v25 = vld [vmem:[%s1778_s15 + $0x4c] ss:$16 sps:$4 sm:$0xff]  }
  0x8c   : > { %v1281_v26 = vld [vmem:[%s1778_s15 + $0x20] ss:$16 sps:$4 sm:$0xff]   ;;  %v1283_v27 = vld [vmem:[%s1778_s15 + $0x4] ss:$16 sps:$4 sm:$0xff]   ;;  %v1294_v28 = vld [vmem:[%s1778_s15 + $0x48] ss:$16 sps:$4 sm:$0xff]  }
  0x8d   : > { %v1297_v29 = vld [vmem:[%s1778_s15 + $0x2c] ss:$16 sps:$4 sm:$0xff]   ;;  %v1287_v30 = vld [vmem:[%s1778_s15] ss:$16 sps:$4 sm:$0xff]   ;;  %v1289_v31 = vld [vmem:[%s1778_s15 + $0x1e4] ss:$16 sps:$4 sm:$0xff]  }
  0x8e   : > { %798 = vmatpush1.bf16.msra.mxu0 %v1258_v9  ;;  %839 = vmatpush1.bf16.msra.mxu1 %v1276_v16  ;;  %v1300_v32 = vld [vmem:[%s1778_s15 + $0x28] ss:$16 sps:$4 sm:$0xff]   ;;  %v1303_v33 = vld [vmem:[%s1778_s15 + $0xc] ss:$16 sps:$4 sm:$0xff]   ;;  %v1293_v34 = vld [vmem:[%s1778_s15 + $0x1e0] ss:$16 sps:$4 sm:$0xff]  }
  0x8f   : > { %799 = vmatprep.subr.bf16.mxu0 %v1259_v10  ;;  %840 = vmatprep.subr.bf16.mxu1 %v1279_v17  ;;  %v1295_v35 = vld [vmem:[%s1778_s15 + $0x1c4] ss:$16 sps:$4 sm:$0xff]   ;;  %v1306_v36 = vld [vmem:[%s1778_s15 + $0x8] ss:$16 sps:$4 sm:$0xff]   ;;  %v1309_v37 = vld [vmem:[%s1778_s15 + $0x1ec] ss:$16 sps:$4 sm:$0xff]  }
  0x90   : > { %v1299_v38 = vld [vmem:[%s1778_s15 + $0x1c0] ss:$16 sps:$4 sm:$0xff]   ;;  %v1301_v39 = vld [vmem:[%s1778_s15 + $0x1a4] ss:$16 sps:$4 sm:$0xff]   ;;  %v1312_v40 = vld [vmem:[%s1778_s15 + $0x1e8] ss:$16 sps:$4 sm:$0xff]  }
  0x91   : > { %v1315_v41 = vld [vmem:[%s1778_s15 + $0x1cc] ss:$16 sps:$4 sm:$0xff]   ;;  %v1305_v42 = vld [vmem:[%s1778_s15 + $0x1a0] ss:$16 sps:$4 sm:$0xff]   ;;  %v1307_v44 = vld [vmem:[%s1778_s15 + $0x184] ss:$16 sps:$4 sm:$0xff]  }
  0x92   : > { %800 = vmatpush1.bf16.msra.mxu0 %v1263_v13  ;;  %841 = vmatpush1.bf16.msra.mxu1 %v1282_v20  ;;  %v376_v43 = vld [vmem:[%s299_s24] sm:$0xff]  ;;  %v447_v8 = vshrl.u32 %v446_v7, 7  ;;  %v444_v10 = vld [vmem:[%s1776_s10] sm:$0xf]  ;;  %s1182_s17 = sshll.u32 %s1611_s25, 7  ;;  %s936_s2 = sshll.u32 %s364_s20, 4  ;;  %s1865_s2 = int_to_ptr.vmem [resolvable:$true] %s936_s2 }
  0x93   : > { %801 = vmatprep.subr.bf16.mxu0 %v1265_v14  ;;  %842 = vmatprep.subr.bf16.mxu1 %v1285_v21  ;;  %v377_v45 = vpack.c.bf16 %v376_v43, %v376_v43  ;;  %v1318_v46 = vld [vmem:[%s1778_s15 + $0x1c8] ss:$16 sps:$4 sm:$0xff]   ;;  %v1321_v47 = vld [vmem:[%s1778_s15 + $0x1ac] ss:$16 sps:$4 sm:$0xff]   ;;  %v1311_v48 = vld [vmem:[%s1778_s15 + $0x180] ss:$16 sps:$4 sm:$0xff]   ;;  %s1863_s13 = scalar_lea.hbm %s1942_s6, %s1182_s17 }
  0x94   : > { %v1313_v49 = vld [vmem:[%s1778_s15 + $0x164] ss:$16 sps:$4 sm:$0xff]   ;;  %v1324_v50 = vld [vmem:[%s1778_s15 + $0x1a8] ss:$16 sps:$4 sm:$0xff]   ;;  %v1327_v51 = vld [vmem:[%s1778_s15 + $0x18c] ss:$16 sps:$4 sm:$0xff]  }
  0x95   : > { %378 = vst [vmem:[#allocation2 + $0x4] sm:$0xf] %v377_v45  ;;  %v1317_v52 = vld [vmem:[%s1778_s15 + $0x160] ss:$16 sps:$4 sm:$0xff]   ;;  %v1319_v53 = vld [vmem:[%s1778_s15 + $0x144] ss:$16 sps:$4 sm:$0xff]  }
  0x96   : > { %802 = vmatpush1.bf16.msra.mxu0 %v1269_v18  ;;  %843 = vmatpush1.bf16.msra.mxu1 %v1288_v24  ;;  %v1330_v54 = vld [vmem:[%s1778_s15 + $0x188] ss:$16 sps:$4 sm:$0xff]   ;;  %v1333_v56 = vld [vmem:[%s1778_s15 + $0x16c] ss:$16 sps:$4 sm:$0xff]   ;;  %v1323_v58 = vld [vmem:[%s1778_s15 + $0x140] ss:$16 sps:$4 sm:$0xff]  }
  0x97   : > { %803 = vmatprep.subr.bf16.mxu0 %v1271_v19  ;;  %844 = vmatprep.subr.bf16.mxu1 %v1291_v25  ;;  %v1325_v59 = vld [vmem:[%s1778_s15 + $0x124] ss:$16 sps:$4 sm:$0xff]   ;;  %v1336_v60 = vld [vmem:[%s1778_s15 + $0x168] ss:$16 sps:$4 sm:$0xff]   ;;  %v1339_v61 = vld [vmem:[%s1778_s15 + $0x14c] ss:$16 sps:$4 sm:$0xff]  }
  0x98   : > { %v1329_v62 = vld [vmem:[%s1778_s15 + $0x120] ss:$16 sps:$4 sm:$0xff]   ;;  %v1331_v63 = vld [vmem:[%s1778_s15 + $0x104] ss:$16 sps:$4 sm:$0xff]   ;;  %v1341_v0 = vld [vmem:[%s1778_s15 + $0x148] ss:$16 sps:$4 sm:$0xff]  }
  0x99   : > { %v1342_v1 = vld [vmem:[%s1778_s15 + $0x12c] ss:$16 sps:$4 sm:$0xff]   ;;  %v1335_v2 = vld [vmem:[%s1778_s15 + $0x100] ss:$16 sps:$4 sm:$0xff]   ;;  %v1344_v3 = vld [vmem:[%s1778_s15 + $0x128] ss:$16 sps:$4 sm:$0xff]  }
  0x9a   : > { %804 = vmatpush1.bf16.msra.mxu0 %v1275_v22  ;;  %845 = vmatpush1.bf16.msra.mxu1 %v1294_v28  ;;  %v1345_v4 = vld [vmem:[%s1778_s15 + $0x10c] ss:$16 sps:$4 sm:$0xff]   ;;  %v1347_v6 = vld [vmem:[%s1778_s15 + $0x108] ss:$16 sps:$4 sm:$0xff]   ;;  %v448_v9 = vsub.s32 0, %v447_v8  ;;  %v452_v11 = vsub.s32 1, %v447_v8 }
  0x9b   : > { %805 = vmatprep.subr.bf16.mxu0 %v1277_v23  ;;  %846 = vmatprep.subr.bf16.mxu1 %v1297_v29  ;;  %v460_v20 = vsub.s32 3, %v447_v8  ;;  %v456_v24 = vsub.s32 2, %v447_v8  ;;  %s910_s26 = scalar_lea.sflag [#allocation11], %s1753_s29  ;;  %p1967_p10 = scmp.ne.s32.totalorder %s1957_s8, 0 }
  0x9c   : > { %v379_v55 = vld [vmem:[#allocation2] sm:$0xff]  ;;  %v449_v12 = vrot.slane %v444_v10, %v448_v9  ;;  %v453_v13 = vrot.slane %v444_v10, %v452_v11  ;;  %s1553_s23 = smov [#allocation10]  }
  0x9d   : > { %v1112_v57 = vcombine.high %v379_v55, %v379_v55  ;;  %v1111_v5 = vcombine.low %v379_v55, %v379_v55  ;;  %v457_v28 = vrot.slane %v444_v10, %v456_v24  ;;  %s1452_s30 = sshll.u32 %s1553_s23, 4  ;;  %s1453_s30 = int_to_ptr.vmem [resolvable:$false] %s1452_s30 }
  0x9e   : > { %806 = vmatpush1.bf16.msra.mxu0 %v1281_v26  ;;  %847 = vmatpush1.bf16.msra.mxu1 %v1300_v32  ;;  %v461_v26 = vrot.slane %v444_v10, %v460_v20  ;;  %s1454_s27 = scalar_lea.vmem %s1453_s30, 256  ;;  %p1455_p9 = scmp.lt.s32.totalorder %s1865_s2, %s1453_s30 }
  0x9f   : > { %807 = vmatprep.subr.bf16.mxu0 %v1283_v27  ;;  %848 = vmatprep.subr.bf16.mxu1 %v1303_v33 }
  0xa0   : > { %825 = vmatprep.mubr.bf16.mxu0 %v1112_v57  ;;  %866 = vmatprep.mubr.bf16.mxu1 %v1112_v57 }
  0xa2   : > { %808 = vmatpush1.bf16.msra.mxu0 %v1287_v30  ;;  %849 = vmatpush1.bf16.msra.mxu1 %v1306_v36 }
  0xa3   : > { %809 = vmatprep.subr.bf16.mxu0 %v1289_v31  ;;  %850 = vmatprep.subr.bf16.mxu1 %v1309_v37 }
  0xa6   : > { %810 = vmatpush2.bf16.msra.mxu0 %v1293_v34  ;;  %851 = vmatpush2.bf16.msra.mxu1 %v1312_v40  ;;  %v894_v40 = vld [vmem:[%s308_s11] sm:$0xff]  ;;  %s1448_s11 = scalar_lea.vmem %s1865_s2, 128 }
  0xa7   : > { %811 = vmatprep.subr.bf16.mxu0 %v1295_v35  ;;  %852 = vmatprep.subr.bf16.mxu1 %v1315_v41  ;;  %p1449_p8 = scmp.ne.s32.totalorder %s1865_s2, %s1448_s11  ;;  %p1456_p3 = scmp.lt.s32.totalorder %s1454_s27, %s1448_s11 }
  0xa9   : > { %p1450_p0 = pnand %p1449_p8, %p1967_p10  ;;  %p1457_p6 = por %p1456_p3, %p1455_p9 }
  0xaa   : > { %812 = vmatpush2.bf16.msra.mxu0 %v1299_v38  ;;  %853 = vmatpush2.bf16.msra.mxu1 %v1318_v46 }
  0xab   : > { %813 = vmatprep.subr.bf16.mxu0 %v1301_v39  ;;  %854 = vmatprep.subr.bf16.mxu1 %v1321_v47  ;;  %p1451_p2 = pneg %p1450_p0 }
  0xad   : > { %p1458_p12 = pnand %p1457_p6, %p1451_p2 }
  0xae   : > { %814 = vmatpush2.bf16.msra.mxu0 %v1305_v42  ;;  %855 = vmatpush2.bf16.msra.mxu1 %v1324_v50 }
  0xaf   : > { %815 = vmatprep.subr.bf16.mxu0 %v1307_v44  ;;  %856 = vmatprep.subr.bf16.mxu1 %v1327_v51 }
  0xb2   : > { %816 = vmatpush2.bf16.msra.mxu0 %v1311_v48  ;;  %857 = vmatpush2.bf16.msra.mxu1 %v1330_v54 }
  0xb3   : > { %817 = vmatprep.subr.bf16.mxu0 %v1313_v49  ;;  %858 = vmatprep.subr.bf16.mxu1 %v1333_v56 }
  0xb6   : > { %818 = vmatpush2.bf16.msra.mxu0 %v1317_v52  ;;  %859 = vmatpush2.bf16.msra.mxu1 %v1336_v60 }
  0xb7   : > { %819 = vmatprep.subr.bf16.mxu0 %v1319_v53  ;;  %860 = vmatprep.subr.bf16.mxu1 %v1339_v61 }
  0xba   : > { %820 = vmatpush2.bf16.msra.mxu0 %v1323_v58  ;;  %861 = vmatpush2.bf16.msra.mxu1 %v1341_v0 }
  0xbb   : > { %821 = vmatprep.subr.bf16.mxu0 %v1325_v59  ;;  %862 = vmatprep.subr.bf16.mxu1 %v1342_v1 }
  0xbe   : > { %822 = vmatpush2.bf16.msra.mxu0 %v1329_v62  ;;  %863 = vmatpush2.bf16.msra.mxu1 %v1344_v3 }
  0xbf   : > { %823 = vmatprep.subr.bf16.mxu0 %v1331_v63  ;;  %864 = vmatprep.subr.bf16.mxu1 %v1345_v4 }
  0xc2   : > { %824 = vmatpush2.bf16.msra.mxu0 %v1335_v2  ;;  %865 = vmatpush2.bf16.msra.mxu1 %v1347_v6 }
  0xc5   : > { %826 = vmatmul.mubr.bf16.vlgmr.msra.gmra.mxu0 %v1111_v5  ;;  %867 = vmatmul.mubr.bf16.vlgmr.msra.gmra.mxu1 %v1111_v5 }
 0x185   : > { %v827_v14 = vpop.f32.mrf.mxu0  ;;  %v868_v22 = vpop.f32.mrf.mxu1 }
 0x186   : > { %v828_v15 = vadd.f32 %v827_v14, %v449_v12  ;;  %v869_v31 = vadd.f32 %v868_v22, %v457_v28 }
 0x187   : > { %v829_v16 = vpop.f32.mrf.mxu0  ;;  %v870_v25 = vpop.f32.mrf.mxu1 }
 0x188   : > { %v1177_v17 = vmul.f32 -1.442695, %v828_v15  ;;  %v830_v18 = vadd.f32 %v829_v16, %v453_v13  ;;  %v871_v30 = vadd.f32 %v870_v25, %v461_v26 }
 0x189   : > { %v831_v19 = vpop.f32.mrf.mxu0  ;;  %v872_v27 = vpop.f32.mrf.mxu1 }
 0x18a   : > { %1348 = vpow2.f32 %v1177_v17  ;;  %v1178_v21 = vmul.f32 -1.442695, %v830_v18  ;;  %v1179_v32 = vmul.f32 -1.442695, %v871_v30 }
 0x18b   : > { %v832_v23 = vpop.f32.mrf.mxu0  ;;  %v873_v29 = vpop.f32.mrf.mxu1 }
 0x18c   : > { %1350 = vpow2.f32 %v1178_v21 }
 0x18d   : > { %1352 = vtanh.f32 %v869_v31 }
 0x18e   : > { %1354 = vpow2.f32 %v1179_v32 }
 0x197   : > { %v1349_v33 = vpop.eup %1348 }
 0x198   : > { %v878_v34 = vadd.f32 1.0, %v1349_v33 }
 0x199   : > { %v1351_v35 = vpop.eup %1350 }
 0x19a   : > { %1356 = vrcp.f32 %v878_v34  ;;  %v884_v36 = vadd.f32 1.0, %v1351_v35  ;;  %v1353_v37 = vpop.eup %1352 }
 0x19b   : > { %v1355_v38 = vpop.eup %1354 }
 0x19c   : > { %1358 = vrcp.f32 %v884_v36  ;;  %v891_v42 = vadd.f32 1.0, %v1355_v38 }
 0x19e   : > { %1360 = vrcp.f32 %v891_v42 }
 0x1a7   : > { %v1357_v39 = vpop.eup %1356 }
 0x1a8   : > { %v896_v44 = vmul.f32 %v1357_v39, %v1353_v37 }
 0x1a9   : > { %v1359_v41 = vpop.eup %1358 }
 0x1aa   : > { %v895_v43 = vmul.f32 %v1359_v41, %v894_v40 }
 0x1ac   : > { %v897_v45 = vadd.f32 %v896_v44, %v895_v43 }
 0x1ae   : > { %1362 = vtanh.f32 %v897_v45  ;;  %901 = vst [vmem:[%s364_s20] sm:$0xff] %v897_v45 }
 0x1af   : > { %1461 = shalt.err (!%p1458_p12)
}
 0x1b0   : > { %s1462_s28 = scalar_lea.hbm %s1863_s13, 128  ;;  %s1466_s15 = scalar_lea.hbm %s1942_s6, 256 }
 0x1b1   : > { %p1463_p4 = scmp.ne.s32.totalorder %s1863_s13, %s1462_s28  ;;  %p1467_p7 = scmp.lt.s32.totalorder %s1863_s13, %s1942_s6 }
 0x1b2   : > { %p1468_p13 = scmp.lt.s32.totalorder %s1466_s15, %s1462_s28 }
 0x1b3   : > { %p1464_p5 = pnand %p1463_p4, %p1967_p10 }
 0x1b4   : > { %p1469_p11 = por %p1468_p13, %p1467_p7 }
 0x1b5   : > { %p1465_p1 = pneg %p1464_p5 }
 0x1b7   : > { %p1470_p8 = pnand %p1469_p11, %p1465_p1 }
 0x1b9   : > { %1473 = shalt.err (!%p1470_p8)
}
 0x1ba   : > { %1194 = dma.vmem_to_hbm [thread:$0]  (%p1967_p10), %s1865_s2, 128, %s1863_s13, %s910_s26   ;;  %v1361_v46 = vpop.eup %1360 }
 0x1bb   : > { %s923_s18 = sshll.u32 %s357_s19, 4  ;;  %v1363_v47 = vpop.eup %1362  ;;  %s1897_s11 = scalar_lea.hbm %s1941_s5, %s1182_s17  ;;  %s924_s18 = int_to_ptr.vmem [resolvable:$true] %s923_s18 }
 0x1bc   : > { %v899_v48 = vmul.f32 %v1363_v47, %v1361_v46  ;;  %s905_s23 = scalar_lea.sflag [#allocation5], %s1753_s29  ;;  %s1474_s30 = scalar_lea.vmem %s924_s18, 128 }
 0x1bd   : > { %p1475_p0 = scmp.ne.s32.totalorder %s924_s18, %s1474_s30  ;;  %s1554_s2 = smov [#allocation9]  }
 0x1be   : > { %900 = vst [vmem:[%s357_s19] sm:$0xff] %v899_v48  ;;  %v902_v49 = vpack.c.bf16 %v899_v48, %v899_v48  ;;  %s1478_s13 = sshll.u32 %s1554_s2, 4  ;;  %s1479_s13 = int_to_ptr.vmem [resolvable:$false] %s1478_s13 }
 0x1bf   : > { %p1476_p2 = pnand %p1475_p0, %p1967_p10  ;;  %s1480_s26 = scalar_lea.vmem %s1479_s13, 256 }
 0x1c0   : > { %p1481_p3 = scmp.lt.s32.totalorder %s924_s18, %s1479_s13  ;;  %p1482_p6 = scmp.lt.s32.totalorder %s1480_s26, %s1474_s30 }
 0x1c1   : > { %p1477_p9 = pneg %p1476_p2 }
 0x1c2   : > { %p1483_p12 = por %p1482_p6, %p1481_p3 }
 0x1c4   : > { %p1484_p4 = pnand %p1483_p12, %p1477_p9 }
 0x1c6   : > { %1487 = shalt.err (!%p1484_p4)
}
 0x1c7   : > { %s1488_s25 = scalar_lea.hbm %s1897_s11, 128  ;;  %s1492_s19 = scalar_lea.hbm %s1941_s5, 256 }
 0x1c8   : > { %p1489_p5 = scmp.ne.s32.totalorder %s1897_s11, %s1488_s25  ;;  %p1493_p13 = scmp.lt.s32.totalorder %s1897_s11, %s1941_s5 }
 0x1c9   : > { %p1494_p11 = scmp.lt.s32.totalorder %s1492_s19, %s1488_s25 }
 0x1ca   : > { %p1490_p1 = pnand %p1489_p5, %p1967_p10 }
 0x1cb   : > { %p1495_p8 = por %p1494_p11, %p1493_p13 }
 0x1cc   : > { %p1491_p7 = pneg %p1490_p1 }
 0x1ce   : > { %p1496_p0 = pnand %p1495_p8, %p1491_p7 }
 0x1d0   : > { %1499 = shalt.err (!%p1496_p0)
}
 0x1d1   : > { %1193 = dma.vmem_to_hbm [thread:$0]  (%p1967_p10), %s924_s18, 128, %s1897_s11, %s905_s23   ;;  %903 = vst [vmem:[#allocation2] sm:$0xf] %v902_v49 }
 0x1d2 PF: > { %s1968_s28 = sld [smem:[#allocation17_spill]]  ;;  %s948_s16 = sand.u32 1, %s1534_s21  }
 0x1d3   : > { %p1969_p2 = scmp.ne.s32.totalorder %s1958_s9, 0  ;;  %s949_s10 = scalar_lea.sflag [#allocation5], %s948_s16 }
 0x1d8   : > { %p1970_p9 = scmp.ge.s32.totalorder %s1968_s28, 2 }
 0x1da   : > { %p1208_p3 = pnand %p1970_p9, %p1969_p2 }
 0x1dc   : > { %p1209_p6 = pneg %p1208_p3 }
 0x1de   : > { %1525 = dma.done.wait (%p1209_p6), %s949_s10, 128  }
 0x1df   : > { %1527 = vsyncadd (%p1209_p6), %s949_s10, 4294967168  ;;  %s958_s15 = scalar_lea.sflag [#allocation11], %s948_s16 }
 0x1e0   : > { %1529 = dma.done.wait (%p1209_p6), %s958_s15, 128  }
 0x1e1   : > { %1531 = vsyncadd (%p1209_p6), %s958_s15, 4294967168  ;;  %s1971_s24 = sld [smem:[#allocation18_spill]]  ;;  %s1974_s21 = smov %s1538_s22 }
 0x1e2   : > { %s1972_s8 = sld [smem:[#allocation16_spill]] }
 0x1e3   : > { %s1973_s23 = sld [smem:[#allocation19_spill]] }
 0x1e7   : > { %p26_p10 = scmp.ge.s32.totalorder %s1971_s24, 4  }
 0x1e8   : > { %s1975_s22 = smov %s1972_s8 }
 0x1e9   :  { %28 = sbr.rel (!%p26_p10) target bundleno = 11 (0xb), region = 133 }
 0x1ee   :  { %963 = vsyncpa [#allocation4], 1 }
 0x1ef   :  { %965 = vsyncpa [#allocation4 + $0x1], 1 }
 0x1f0   :  { %966 = vsyncpa [#allocation7], 1 }
 0x1f1   :  { %968 = vsyncpa [#allocation7 + $0x1], 1 }
 0x1f2   :  { %969 = vsyncpa [#allocation5], 1 }
 0x1f3   :  { %971 = vsyncpa [#allocation5 + $0x1], 1 }
 0x1f4   :  { %972 = vsyncpa [#allocation11], 1 }
 0x1f5   :  { %974 = vsyncpa [#allocation11 + $0x1], 1 }

</bundles_post_ra>
